<compile_context>
chip_gen: v5e
topology: v5e:2x2
jax: 0.10.0
libtpu: 0.0.40
codegen_flags: <defaults>
</compile_context>

<pallas_src>
import jax
import jax.numpy as jnp
from jax.experimental import pallas as pl
from jax.experimental.pallas import tpu as pltpu


def _linear_block_kernel(x_ref, w1_ref, t1_ref, w2_ref, t2_ref, o_ref):
    """One (C, tl) column tile of positions through the full residual block.

    x_ref  : (1, C, tl) f32 input slab (channels on sublanes, positions on lanes)
    w1_ref : (C, C)     conv1 weight with BN1 scale folded in (y = w1 @ x)
    t1_ref : (C, 1)     folded BN1 shift = (bias1 - mean1) * s1 + beta1
    w2_ref, t2_ref : same for the second conv / BN
    o_ref  : (1, C, tl) f32 output slab (x + y)
    """
    x = x_ref[0]                       # (C, tl) f32
    mm_dtype = w1_ref.dtype            # f32 or bf16 matmul path

    # conv1 (1x1) + folded batchnorm1 + LeakyReLU(0.2)
    h = jnp.dot(w1_ref[...], x.astype(mm_dtype),
                preferred_element_type=jnp.float32)
    h = h + t1_ref[...]                # (C,1) sublane shift, broadcast over lanes
    h = jnp.where(h >= 0, h, 0.2 * h)
    # dropout: identity in eval mode.

    # conv2 (1x1) + folded batchnorm2 + LeakyReLU(0.2)
    h = jnp.dot(w2_ref[...], h.astype(mm_dtype),
                preferred_element_type=jnp.float32)
    h = h + t2_ref[...]
    h = jnp.where(h >= 0, h, 0.2 * h)
    # dropout: identity in eval mode.

    # residual add in f32
    o_ref[0] = x + h


def linear_block_forward(x_ncl, params, *, lane_tile=512, use_bf16_matmul=False):
    """x_ncl: (N, C, L) float32 — same layout as the PyTorch module input."""
    N, C, L = x_ncl.shape
    eps = 1e-5

    # ---- Fold conv bias + eval-mode BatchNorm into weights / per-channel shift.
    s1 = params["gamma1"] / jnp.sqrt(params["var1"] + eps)
    t1 = (params["b1"] - params["mean1"]) * s1 + params["beta1"]
    s2 = params["gamma2"] / jnp.sqrt(params["var2"] + eps)
    t2 = (params["b2"] - params["mean2"]) * s2 + params["beta2"]

    mm_dtype = jnp.bfloat16 if use_bf16_matmul else jnp.float32
    w1f = (params["w1"] * s1[:, None]).astype(mm_dtype)   # (C_out, C_in), row-scaled
    w2f = (params["w2"] * s2[:, None]).astype(mm_dtype)
    t1 = t1.reshape(C, 1).astype(jnp.float32)
    t2 = t2.reshape(C, 1).astype(jnp.float32)

    # ---- Lane (position) tiling: keep L on the 128-lane axis, lane-dense tiles.
    if L <= lane_tile:
        tl, Lp = L, L                       # one full-width tile, no padding
    else:
        tl = lane_tile                      # 128-aligned lane tile
        Lp = pl.cdiv(L, tl) * tl            # zero-pad tail to a tile multiple
    x_in = x_ncl if Lp == L else jnp.pad(x_ncl, ((0, 0), (0, 0), (0, Lp - L)))

    grid = (N, Lp // tl)                    # both axes independent -> "parallel"

    # ---- VMEM budget (double-buffered weights + x/out tiles), capped for v7x.
    wbytes = 2 if use_bf16_matmul else 4
    vmem_est = (2 * 2 * C * C * wbytes      # two weights, double-buffered
                + 2 * 2 * C * tl * 4        # x and out tiles, double-buffered
                + 2 * 2 * C * 4)            # shifts
    vmem_limit = int(min(max(2 * vmem_est, 32 * 1024 * 1024), 64 * 1024 * 1024))

    cost = pl.CostEstimate(
        flops=4 * N * Lp * C * C,                                  # two matmuls
        transcendentals=0,
        bytes_accessed=2 * N * C * Lp * 4 + 2 * C * C * wbytes + 2 * C * 4,
    )

    out = pl.pallas_call(
        _linear_block_kernel,
        out_shape=jax.ShapeDtypeStruct((N, C, Lp), jnp.float32),
        grid_spec=pltpu.PrefetchScalarGridSpec(
            num_scalar_prefetch=0,
            grid=grid,
            in_specs=[
                pl.BlockSpec((1, C, tl), lambda n, j: (n, 0, j)),   # x slab
                pl.BlockSpec((C, C), lambda n, j: (0, 0)),          # w1 (BN-folded)
                pl.BlockSpec((C, 1), lambda n, j: (0, 0)),          # t1 shift
                pl.BlockSpec((C, C), lambda n, j: (0, 0)),          # w2 (BN-folded)
                pl.BlockSpec((C, 1), lambda n, j: (0, 0)),          # t2 shift
            ],
            out_specs=pl.BlockSpec((1, C, tl), lambda n, j: (n, 0, j)),
        ),
        compiler_params=pltpu.CompilerParams(
            dimension_semantics=("parallel", "parallel"),
            vmem_limit_bytes=vmem_limit,
        ),
        cost_estimate=cost,
    )(x_in, w1f, t1, w2f, t2)

    return out if Lp == L else out[:, :, :L]


def _reference_forward(x_ncl, params):
    """Pure-JAX reference with identical (eval-mode) semantics."""
    eps = 1e-5
    N, C, L = x_ncl.shape
    x2d = jnp.transpose(x_ncl, (0, 2, 1)).reshape(N * L, C)

    def branch(h, w, b, gamma, beta, mean, var):
        h = h @ w.T + b
        h = (h - mean) / jnp.sqrt(var + eps) * gamma + beta
        return jnp.where(h >= 0, h, 0.2 * h)

    y = branch(x2d, params["w1"], params["b1"], params["gamma1"],
               params["beta1"], params["mean1"], params["var1"])
    y = branch(y, params["w2"], params["b2"], params["gamma2"],
               params["beta2"], params["mean2"], params["var2"])
    out = x2d + y
    return jnp.transpose(out.reshape(N, L, C), (0, 2, 1))


def init_params(key, linear_size):
    C = linear_size
    ks = jax.random.split(key, 8)
    scale = 1.0 / jnp.sqrt(C)
    return {
        # Conv1d(kernel_size=1) weights stored as (C_out, C_in) (squeezed k dim).
        "w1": jax.random.uniform(ks[0], (C, C), jnp.float32, -scale, scale),
        "b1": jax.random.uniform(ks[1], (C,), jnp.float32, -scale, scale),
        "w2": jax.random.uniform(ks[2], (C, C), jnp.float32, -scale, scale),
        "b2": jax.random.uniform(ks[3], (C,), jnp.float32, -scale, scale),
        # BatchNorm1d affine params + running stats (deterministic, synthetic).
        "gamma1": 1.0 + 0.1 * jax.random.normal(ks[4], (C,), jnp.float32),
        "beta1": 0.1 * jax.random.normal(ks[5], (C,), jnp.float32),
        "mean1": 0.05 * jnp.arange(C, dtype=jnp.float32) / C,
        "var1": 1.0 + 0.02 * jnp.arange(C, dtype=jnp.float32) / C,
        "gamma2": 1.0 + 0.1 * jax.random.normal(ks[6], (C,), jnp.float32),
        "beta2": 0.1 * jax.random.normal(ks[7], (C,), jnp.float32),
        "mean2": -0.03 * jnp.arange(C, dtype=jnp.float32) / C,
        "var2": 1.0 + 0.01 * jnp.arange(C, dtype=jnp.float32) / C,
    }


if __name__ == "__main__":
    key = jax.random.PRNGKey(0)
    kx, kp, kx2, kp2 = jax.random.split(key, 4)

    # Case 1: small demo shape (batch N=2, channels C=linear_size=32, length L=8).
    N, C, L = 2, 32, 8
    x = jax.random.normal(kx, (N, C, L), jnp.float32)
    params = init_params(kp, C)

    out = jax.block_until_ready(linear_block_forward(x, params))
    ref = _reference_forward(x, params)
    assert out.shape == (N, C, L)
    assert jnp.allclose(out, ref, atol=1e-4, rtol=1e-4), "f32 mismatch vs reference"

    # Mixed-precision (bf16 MXU) path on the same shape; f32 residual/tail.
    out_bf16 = jax.block_until_ready(
        linear_block_forward(x, params, use_bf16_matmul=True))
    assert jnp.allclose(out_bf16, ref, atol=3e-2, rtol=3e-2), "bf16 mismatch vs reference"

    # Case 2: longer sequence exercises 128-aligned lane tiling + zero-pad tail
    # (L=640 > lane_tile=512 -> padded to 1024, grid = (2, 2), all "parallel").
    N2, C2, L2 = 2, 64, 640
    x2 = jax.random.normal(kx2, (N2, C2, L2), jnp.float32)
    params2 = init_params(kp2, C2)
    out2 = jax.block_until_ready(
        linear_block_forward(x2, params2, lane_tile=512))
    ref2 = _reference_forward(x2, params2)
    assert out2.shape == (N2, C2, L2)
    assert jnp.allclose(out2, ref2, atol=1e-4, rtol=1e-4), "tiled mismatch vs reference"

    print("KERNEL_OK")
</pallas_src>

<mosaic_0001>
module attributes {stable_mosaic.version = 11 : i64} {
  func.func @_linear_block_kernel(%arg0: i32, %arg1: i32, %arg2: memref<1x32x8xf32, #tpu.memory_space<vmem>>, %arg3: memref<32x32xf32, #tpu.memory_space<vmem>>, %arg4: memref<32x1xf32, #tpu.memory_space<vmem>>, %arg5: memref<32x32xf32, #tpu.memory_space<vmem>>, %arg6: memref<32x1xf32, #tpu.memory_space<vmem>>, %arg7: memref<1x32x8xf32, #tpu.memory_space<vmem>>) attributes {dimension_semantics = [#tpu.dimension_semantics<parallel>, #tpu.dimension_semantics<parallel>], iteration_bounds = array<i64: 2, 1>, scalar_prefetch = 0 : i64, scratch_operands = 0 : i64, tpu.core_type = #tpu.core_type<tc>, window_params = [{transform_indices = @transform_0, window_bounds = array<i64: 1, 32, 8>}, {pipeline_mode = #tpu.pipeline_mode<synchronous>, transform_indices = @transform_1, window_bounds = array<i64: 32, 32>}, {pipeline_mode = #tpu.pipeline_mode<synchronous>, transform_indices = @transform_2, window_bounds = array<i64: 32, 1>}, {pipeline_mode = #tpu.pipeline_mode<synchronous>, transform_indices = @transform_3, window_bounds = array<i64: 32, 32>}, {pipeline_mode = #tpu.pipeline_mode<synchronous>, transform_indices = @transform_4, window_bounds = array<i64: 32, 1>}, {transform_indices = @transform_5, window_bounds = array<i64: 1, 32, 8>}]} {
    %c0 = arith.constant 0 : index
    %c0_0 = arith.constant 0 : index
    %c0_1 = arith.constant 0 : index
    %0 = vector.load %arg2[%c0, %c0_0, %c0_1] : memref<1x32x8xf32, #tpu.memory_space<vmem>>, vector<1x32x8xf32>
    %1 = vector.shape_cast %0 : vector<1x32x8xf32> to vector<32x8xf32>
    %c0_2 = arith.constant 0 : index
    %c0_3 = arith.constant 0 : index
    %2 = vector.load %arg3[%c0_2, %c0_3] : memref<32x32xf32, #tpu.memory_space<vmem>>, vector<32x32xf32>
    %cst = arith.constant dense<0.000000e+00> : vector<32x8xf32>
    %3 = tpu.matmul %2, %1, %cst {dimension_numbers = #tpu.dot_dimension_numbers<[1], [0], [0], [1], [0, 0, 1, 1], [], []>} : vector<32x32xf32>, vector<32x8xf32>, vector<32x8xf32> -> vector<32x8xf32>
    %c0_4 = arith.constant 0 : index
    %c0_5 = arith.constant 0 : index
    %4 = vector.load %arg4[%c0_4, %c0_5] : memref<32x1xf32, #tpu.memory_space<vmem>>, vector<32x1xf32>
    %5 = vector.broadcast %4 : vector<32x1xf32> to vector<32x8xf32>
    %6 = arith.addf %3, %5 : vector<32x8xf32>
    %cst_6 = arith.constant 0.000000e+00 : f32
    %7 = vector.broadcast %cst_6 : f32 to vector<32x8xf32>
    %8 = arith.cmpf oge, %6, %7 : vector<32x8xf32>
    %cst_7 = arith.constant 2.000000e-01 : f32
    %9 = vector.broadcast %cst_7 : f32 to vector<32x8xf32>
    %10 = arith.mulf %9, %6 : vector<32x8xf32>
    %11 = arith.select %8, %6, %10 : vector<32x8xi1>, vector<32x8xf32>
    %c0_8 = arith.constant 0 : index
    %c0_9 = arith.constant 0 : index
    %12 = vector.load %arg5[%c0_8, %c0_9] : memref<32x32xf32, #tpu.memory_space<vmem>>, vector<32x32xf32>
    %cst_10 = arith.constant dense<0.000000e+00> : vector<32x8xf32>
    %13 = tpu.matmul %12, %11, %cst_10 {dimension_numbers = #tpu.dot_dimension_numbers<[1], [0], [0], [1], [0, 0, 1, 1], [], []>} : vector<32x32xf32>, vector<32x8xf32>, vector<32x8xf32> -> vector<32x8xf32>
    %c0_11 = arith.constant 0 : index
    %c0_12 = arith.constant 0 : index
    %14 = vector.load %arg6[%c0_11, %c0_12] : memref<32x1xf32, #tpu.memory_space<vmem>>, vector<32x1xf32>
    %15 = vector.broadcast %14 : vector<32x1xf32> to vector<32x8xf32>
    %16 = arith.addf %13, %15 : vector<32x8xf32>
    %cst_13 = arith.constant 0.000000e+00 : f32
    %17 = vector.broadcast %cst_13 : f32 to vector<32x8xf32>
    %18 = arith.cmpf oge, %16, %17 : vector<32x8xf32>
    %cst_14 = arith.constant 2.000000e-01 : f32
    %19 = vector.broadcast %cst_14 : f32 to vector<32x8xf32>
    %20 = arith.mulf %19, %16 : vector<32x8xf32>
    %21 = arith.select %18, %16, %20 : vector<32x8xi1>, vector<32x8xf32>
    %22 = arith.addf %1, %21 : vector<32x8xf32>
    %c0_15 = arith.constant 0 : index
    %c0_16 = arith.constant 0 : index
    %c0_17 = arith.constant 0 : index
    %23 = vector.load %arg7[%c0_15, %c0_16, %c0_17] : memref<1x32x8xf32, #tpu.memory_space<vmem>>, vector<1x32x8xf32>
    %24 = vector.shape_cast %23 : vector<1x32x8xf32> to vector<32x8xf32>
    %25 = vector.shape_cast %22 : vector<32x8xf32> to vector<1x32x8xf32>
    tpu.vector_store %arg7[%c0_15, %c0_16, %c0_17], %25 {strides = array<i32>} : memref<1x32x8xf32, #tpu.memory_space<vmem>>, vector<1x32x8xf32>,
    return
  }
  func.func @transform_0(%arg0: i32, %arg1: i32) -> (i32, i32, i32) {
    %c0_i32 = arith.constant 0 : i32
    %c0_i32_0 = arith.constant 0 : i32
    return %arg0, %c0_i32, %arg1 : i32, i32, i32
  }
  func.func @transform_1(%arg0: i32, %arg1: i32) -> (i32, i32) {
    %c0_i32 = arith.constant 0 : i32
    %c0_i32_0 = arith.constant 0 : i32
    %c0_i32_1 = arith.constant 0 : i32
    return %c0_i32, %c0_i32_0 : i32, i32
  }
  func.func @transform_2(%arg0: i32, %arg1: i32) -> (i32, i32) {
    %c0_i32 = arith.constant 0 : i32
    %c0_i32_0 = arith.constant 0 : i32
    %c0_i32_1 = arith.constant 0 : i32
    return %c0_i32, %c0_i32_0 : i32, i32
  }
  func.func @transform_3(%arg0: i32, %arg1: i32) -> (i32, i32) {
    %c0_i32 = arith.constant 0 : i32
    %c0_i32_0 = arith.constant 0 : i32
    %c0_i32_1 = arith.constant 0 : i32
    return %c0_i32, %c0_i32_0 : i32, i32
  }
  func.func @transform_4(%arg0: i32, %arg1: i32) -> (i32, i32) {
    %c0_i32 = arith.constant 0 : i32
    %c0_i32_0 = arith.constant 0 : i32
    %c0_i32_1 = arith.constant 0 : i32
    return %c0_i32, %c0_i32_0 : i32, i32
  }
  func.func @transform_5(%arg0: i32, %arg1: i32) -> (i32, i32, i32) {
    %c0_i32 = arith.constant 0 : i32
    %c0_i32_0 = arith.constant 0 : i32
    return %arg0, %c0_i32, %arg1 : i32, i32, i32
  }
}

</mosaic_0001>

<bundles_post_ra>
// kernel: tpu_custom_call.1
= control target key start
LH: loop header
LB: loop body
LE: loop exit
PB: predicated region body
PF: predicated region fallthrough
CT: control target
= control target key end

     0   :  { %s627_s18 = smov 0   ;;  %s629_s19 = smov 0   ;;  %s747_s0 = inlined_call_operand.vmem [shape: f32[2,32,8], index: 0, kind: input, shape index: {}]   ;;  %s748_s1 = inlined_call_operand.vmem [shape: f32[32,32], index: 1, kind: input, shape index: {}]   ;;  %s749_s2 = inlined_call_operand.vmem [shape: f32[32,1], index: 2, kind: input, shape index: {}]   ;;  %s750_s3 = inlined_call_operand.vmem [shape: f32[32,32], index: 3, kind: input, shape index: {}]   ;;  %s751_s4 = inlined_call_operand.vmem [shape: f32[32,1], index: 4, kind: input, shape index: {}]   ;;  %s752_s5 = inlined_call_operand.vmem [shape: f32[2,32,8], index: 5, kind: output, shape index: {}]  }
   0x1   :  { %s631_s20 = smov 0  }
   0x2 LB: > { %s27_s21 = sadd.s32 1, %s590_s19  ;;  %p519_p0 = scmp.ge.s32.totalorder %s594_s20, 1  ;;  %s594_s20 = sphi %s631_s20, %s15_s20   ;;  %s590_s19 = sphi %s629_s19, %s754_s19   ;;  %s586_s18 = sphi %s627_s18, %s753_s18  }
   0x3   : > { %p29_p1 = scmp.ge.s32.totalorder %s27_s21, 2  ;;  %p206_p2 = scmp.lt.s32.totalorder %s594_s20, 3 }
   0x5   : > { %s756_s21 = smov (%p29_p1, %s27_s21), 0  ;;  %p207_p3 = pnand %p519_p0, %p206_p2 }
   0x6   : > { %p240_p4 = scmp.lt.s32.totalorder (!%p207_p3), %s586_s18, 1 }
   0x7   : > { %210 = sbr.rel (%p207_p3) target bundleno = 324 (0x144), region = 40 }
   0xc   : > { %v267_v0 = vld [vmem:[%s749_s2 + $0x18] sm:$0xff]  ;;  %v596_v1 = vmov 0   ;;  %v265_v2 = vld [vmem:[%s749_s2 + $0x8] sm:$0xff]  ;;  %s758_s18 = smov (!%p240_p4, %s586_s18), 1  ;;  %v266_v5 = vld [vmem:[%s749_s2 + $0x10] sm:$0xff]  ;;  %vm288_vm0 = vcmask 261120  }
   0xd   : > { %569 = vset.pattern.permute.xlu0 %v596_v1  ;;  %570 = vset.pattern.permute.xlu1 %v596_v1  ;;  %s534_s26 = sshll.u32 %s758_s18, 5  ;;  %v264_v6 = vld [vmem:[%s749_s2] sm:$0xff]  ;;  %v262_v9 = vld [vmem:[%s748_s1 + $0x10] sm:$0xff]  ;;  %v349_v12 = vld [vmem:[%s751_s4 + $0x18] sm:$0xff]  ;;  %vm427_vm6 = vcmask 64512  }
   0xe   : > { %285 = vperm.xlu0 %569, %v267_v0   ;;  %275 = vperm.xlu1 %570, %v265_v2   ;;  %s247_s29 = scalar_lea.vmem %s747_s0, %s534_s26  ;;  %v260_v10 = vld [vmem:[%s748_s1] sm:$0xff]  ;;  %v348_v11 = vld [vmem:[%s751_s4 + $0x10] sm:$0xff]  ;;  %v263_v13 = vld [vmem:[%s748_s1 + $0x18] sm:$0xff]  ;;  %s255_s15 = scalar_lea.vmem %s752_s5, %s534_s26 }
   0xf   : > { %571 = vset.pattern.permute.xlu2 %v596_v1  ;;  %v659_v3 = vld [vmem:[%s247_s29 + $0x18] sm:$0xff]  ;;  %v661_v4 = vld [vmem:[%s247_s29 + $0x10] sm:$0xff]  ;;  %v671_v7 = vld [vmem:[%s247_s29 + $0x8] sm:$0xff] }
  0x10   : > { %536 = vmatpush.msra.mxu2 %v659_v3  ;;  %313 = vmatpush.msra.mxu0 %v659_v3  ;;  %v675_v8 = vld [vmem:[%s247_s29] sm:$0xff]  ;;  %v261_v14 = vld [vmem:[%s748_s1 + $0x8] sm:$0xff]  ;;  %v344_v37 = vld [vmem:[%s750_s3 + $0x10] sm:$0xff] }
  0x11   : > { %v346_v17 = vld [vmem:[%s751_s4] sm:$0xff]  ;;  %v347_v20 = vld [vmem:[%s751_s4 + $0x8] sm:$0xff]  ;;  %v345_v40 = vld [vmem:[%s750_s3 + $0x18] sm:$0xff] }
  0x12   : > { %537 = vmatpush.msra.mxu2 %v661_v4  ;;  %314 = vmatpush.msra.mxu0 %v661_v4  ;;  %v342_v36 = vld [vmem:[%s750_s3] sm:$0xff]  ;;  %v343_v39 = vld [vmem:[%s750_s3 + $0x8] sm:$0xff] }
  0x13   : > { %352 = vperm.xlu2 %571, %v346_v17  }
  0x14   : > { %538 = vmatpush.msra.mxu2 %v671_v7  ;;  %315 = vmatpush.msra.mxu0 %v671_v7 }
  0x16   : > { %280 = vperm.xlu0 %569, %v266_v5   ;;  %270 = vperm.xlu1 %570, %v264_v6  }
  0x17   : > { %539 = vmatpush.msra.mxu2 %v675_v8  ;;  %316 = vmatpush.msra.mxu0 %v675_v8 }
  0x18   : > { %526 = vmatmul.msk.f32.vlgmr.msra.gmra.mxu2 %vm288_vm0, %v262_v9  ;;  %524 = vmatmul.msk.f32.vlgmr.msra.gmra.mxu0 %vm288_vm0, %v260_v10 }
  0x1b   : > { %357 = vperm.xlu2 %571, %v347_v20  }
  0x1e   : > { %362 = vperm.xlu0 %569, %v348_v11   ;;  %367 = vperm.xlu1 %570, %v349_v12  }
  0x20   : > { %527 = vmatmul.msk.f32.gmra.mxu2 %vm288_vm0, %v263_v13  ;;  %525 = vmatmul.msk.f32.gmra.mxu0 %vm288_vm0, %v261_v14 }
  0x6d   : > { %v353_v41 = vpop.permute.xlu2 %352 }
  0x75   : > { %v358_v50 = vpop.permute.xlu2 %357 }
  0x80   : > { %v286_v15 = vpop.permute.xlu0 %285  ;;  %v276_v18 = vpop.permute.xlu1 %275 }
  0x88   : > { %v281_v21 = vpop.permute.xlu0 %280  ;;  %v271_v27 = vpop.permute.xlu1 %270 }
  0x90   : > { %v363_v46 = vpop.permute.xlu0 %362  ;;  %v368_v58 = vpop.permute.xlu1 %367 }
  0x95   : > { %v318_v16 = vpop.f32.mrf.mxu0 }
  0x96   : > { %v319_v28 = vadd.f32 %v318_v16, %v271_v27 }
  0x98   : > { %v334_v34 = vmul.f32 0.2, %v319_v28  ;;  %vm330_vm4 = vcmp.ge.f32.partialorder %v319_v28, 0.0 }
  0x9a   : > { %v338_v38 = vsel %vm330_vm4, %v319_v28, %v334_v34 }
  0x9b   : > { %v324_v19 = vpop.f32.mrf.mxu2 }
  0x9c   : > { %v325_v23 = vadd.f32 %v324_v19, %v281_v21 }
  0x9d   : > { %v321_v22 = vpop.f32.mrf.mxu0 }
  0x9e   : > { %v322_v25 = vadd.f32 %v321_v22, %v276_v18  ;;  %v336_v30 = vmul.f32 0.2, %v325_v23  ;;  %vm332_vm2 = vcmp.ge.f32.partialorder %v325_v23, 0.0 }
  0xa0   : > { %v335_v32 = vmul.f32 0.2, %v322_v25  ;;  %vm331_vm3 = vcmp.ge.f32.partialorder %v322_v25, 0.0  ;;  %v340_v33 = vsel %vm332_vm2, %v325_v23, %v336_v30 }
  0xa2   : > { %v339_v35 = vsel %vm331_vm3, %v322_v25, %v335_v32 }
  0xa3   : > { %v327_v24 = vpop.f32.mrf.mxu2 }
  0xa4   : > { %v328_v26 = vadd.f32 %v327_v24, %v286_v15 }
  0xa6   : > { %vm333_vm1 = vcmp.ge.f32.partialorder %v328_v26, 0.0  ;;  %v337_v29 = vmul.f32 0.2, %v328_v26 }
  0xa8   : > { %v341_v31 = vsel %vm333_vm1, %v328_v26, %v337_v29 }
  0xa9   : > { %394 = vmatpush.msra.mxu1 %v341_v31  ;;  %540 = vmatpush.msra.mxu3 %v341_v31 }
  0xab   : > { %395 = vmatpush.msra.mxu1 %v340_v33  ;;  %541 = vmatpush.msra.mxu3 %v340_v33 }
  0xad   : > { %396 = vmatpush.msra.mxu1 %v339_v35  ;;  %542 = vmatpush.msra.mxu3 %v339_v35 }
  0xaf   : > { %397 = vmatpush.msra.mxu1 %v338_v38  ;;  %543 = vmatpush.msra.mxu3 %v338_v38 }
  0xb0   : > { %528 = vmatmul.msk.f32.vlgmr.msra.gmra.mxu1 %vm288_vm0, %v342_v36  ;;  %530 = vmatmul.msk.f32.vlgmr.msra.gmra.mxu3 %vm288_vm0, %v344_v37 }
  0xb8   : > { %529 = vmatmul.msk.f32.gmra.mxu1 %vm288_vm0, %v343_v39  ;;  %531 = vmatmul.msk.f32.gmra.mxu3 %vm288_vm0, %v345_v40 }
 0x12d   : > { %v399_v42 = vpop.f32.mrf.mxu1 }
 0x12e   : > { %v400_v43 = vadd.f32 %v399_v42, %v353_v41 }
 0x130   : > { %vm411_vm5 = vcmp.ge.f32.partialorder %v400_v43, 0.0  ;;  %v415_v44 = vmul.f32 0.2, %v400_v43 }
 0x132   : > { %v419_v45 = vsel %vm411_vm5, %v400_v43, %v415_v44 }
 0x133   : > { %v423_v47 = vadd.f32 %v419_v45, %v675_v8  ;;  %v405_v48 = vpop.f32.mrf.mxu3 }
 0x134   : > { %v406_v49 = vadd.f32 %v405_v48, %v363_v46 }
 0x135   : > { %428 = vst.msk [vmem:[%s255_s15] sm:$0xff] %vm427_vm6, %v423_v47  ;;  %v402_v51 = vpop.f32.mrf.mxu1 }
 0x136   : > { %vm413_vm7 = vcmp.ge.f32.partialorder %v406_v49, 0.0  ;;  %v417_v52 = vmul.f32 0.2, %v406_v49  ;;  %v403_v53 = vadd.f32 %v402_v51, %v358_v50 }
 0x138   : > { %v421_v54 = vsel %vm413_vm7, %v406_v49, %v417_v52  ;;  %vm412_vm8 = vcmp.ge.f32.partialorder %v403_v53, 0.0  ;;  %v416_v55 = vmul.f32 0.2, %v403_v53 }
 0x139   : > { %v425_v56 = vadd.f32 %v421_v54, %v661_v4 }
 0x13a   : > { %v420_v57 = vsel %vm412_vm8, %v403_v53, %v416_v55 }
 0x13b   : > { %430 = vst.msk [vmem:[%s255_s15 + $0x10] sm:$0xff] %vm427_vm6, %v425_v56  ;;  %v424_v59 = vadd.f32 %v420_v57, %v671_v7  ;;  %v408_v60 = vpop.f32.mrf.mxu3 }
 0x13c   : > { %v409_v61 = vadd.f32 %v408_v60, %v368_v58 }
 0x13d   : > { %429 = vst.msk [vmem:[%s255_s15 + $0x8] sm:$0xff] %vm427_vm6, %v424_v59 }
 0x13e   : > { %vm414_vm9 = vcmp.ge.f32.partialorder %v409_v61, 0.0  ;;  %v418_v62 = vmul.f32 0.2, %v409_v61 }
 0x140   : > { %v422_v63 = vsel %vm414_vm9, %v409_v61, %v418_v62 }
 0x141   : > { %v426_v0 = vadd.f32 %v422_v63, %v659_v3 }
 0x143   : > { %431 = vst.msk [vmem:[%s255_s15 + $0x18] sm:$0xff] %vm427_vm6, %v426_v0 }
 0x144 PF: > { %s15_s20 = sadd.s32 1, %s594_s20   ;;  %s753_s18 = smov %s590_s19 }
 0x145   : > { %p12_p5 = scmp.ge.s32.totalorder %s15_s20, 4   ;;  %s754_s19 = smov %s756_s21 }
 0x147   :  { %14 = sbr.rel (!%p12_p5) target bundleno = 2 (0x2), region = 70 }

</bundles_post_ra>
